<compile_context>
chip_gen: v5e
topology: v5e:2x2
jax: 0.10.0
libtpu: 0.0.40
codegen_flags: <defaults>
</compile_context>

<pallas_src>
import functools

import numpy as np
import jax
import jax.numpy as jnp
from jax import lax
from jax.experimental import pallas as pl
from jax.experimental.pallas import tpu as pltpu


def _round_up(x, m):
    return ((x + m - 1) // m) * m


def _layer_norm_affine(z, gamma, beta, eps):
    # LayerNorm over the channel (last) dim, PyTorch biased-variance convention.
    mean = jnp.mean(z, axis=-1, keepdims=True)
    var = jnp.mean((z - mean) ** 2, axis=-1, keepdims=True)
    return (z - mean) * lax.rsqrt(var + eps) * gamma + beta


def _ffm_kernel(x_ref, w1_ref, b1_ref, w2_ref, b2_ref, g_ref, bt_ref, o_ref,
                *, eps, compute_dtype):
    """d_in == d_out: residual branch is nn.Identity()."""
    x = x_ref[...]
    xm = x.astype(compute_dtype)
    h = jnp.dot(xm, w1_ref[...], preferred_element_type=jnp.float32) + b1_ref[...]
    h = jnp.maximum(h, 0.0).astype(compute_dtype)        # ReLU, bf16-able intermediate
    y = jnp.dot(h, w2_ref[...], preferred_element_type=jnp.float32) + b2_ref[...]
    z = x.astype(jnp.float32) + y                         # identity residual
    o_ref[...] = _layer_norm_affine(z, g_ref[...], bt_ref[...], eps
                                    ).astype(o_ref.dtype)


def _ffm_res_fused_kernel(x_ref, wcat_ref, bcat_ref, w2_ref, b2_ref, g_ref,
                          bt_ref, o_ref, *, eps, compute_dtype, d_hidden):
    """d_in != d_out, w1 and wr packed column-wise -> single MXU launch."""
    xm = x_ref[...].astype(compute_dtype)
    cat = jnp.dot(xm, wcat_ref[...], preferred_element_type=jnp.float32) + bcat_ref[...]
    h = jnp.maximum(cat[:, :d_hidden], 0.0).astype(compute_dtype)
    res = cat[:, d_hidden:]                               # residual linear output (f32)
    y = jnp.dot(h, w2_ref[...], preferred_element_type=jnp.float32) + b2_ref[...]
    z = res + y
    o_ref[...] = _layer_norm_affine(z, g_ref[...], bt_ref[...], eps
                                    ).astype(o_ref.dtype)


def _ffm_res_kernel(x_ref, w1_ref, b1_ref, w2_ref, b2_ref, wr_ref, br_ref,
                    g_ref, bt_ref, o_ref, *, eps, compute_dtype):
    """d_in != d_out, un-fused fallback (d_hidden not a multiple of 128)."""
    xm = x_ref[...].astype(compute_dtype)
    h = jnp.dot(xm, w1_ref[...], preferred_element_type=jnp.float32) + b1_ref[...]
    h = jnp.maximum(h, 0.0).astype(compute_dtype)
    y = jnp.dot(h, w2_ref[...], preferred_element_type=jnp.float32) + b2_ref[...]
    res = jnp.dot(xm, wr_ref[...], preferred_element_type=jnp.float32) + br_ref[...]
    z = res + y
    o_ref[...] = _layer_norm_affine(z, g_ref[...], bt_ref[...], eps
                                    ).astype(o_ref.dtype)


def ffm_forward(x, params, *, eps=1e-5, compute_dtype=jnp.float32,
                row_tile=None, row_tile_cap=1024):
    """Pallas FFM forward.  x: (..., d_in) -> (..., d_out).

    compute_dtype=jnp.bfloat16 is recommended for production on v6e/v7x (MXU
    operands in bf16, f32 accumulation); kept f32 in the self-test tolerance.
    """
    *lead, d_in = x.shape
    d_hidden = params["w1"].shape[1]
    d_out = params["w2"].shape[1]
    use_res_linear = "wr" in params
    if not use_res_linear:
        assert d_in == d_out, "identity residual requires d_in == d_out"

    M = int(np.prod(lead)) if lead else 1
    x2 = x.reshape(M, d_in)                       # native dtype; cast in-kernel

    # Row tile: multiple of 8 (sublane); guarantee >= 2 grid steps when M > 8
    # so both v7x TensorCores get work; cap amortizes per-step overhead while
    # keeping per-step VMEM at a few MiB.
    if row_tile is None:
        row_tile = min(_round_up(pl.cdiv(M, 2), 8), row_tile_cap)
    row_tile = max(8, _round_up(row_tile, 8))
    grid = (pl.cdiv(M, row_tile),)                # ragged tail handled by Pallas

    cd = jnp.dtype(compute_dtype)
    w1 = params["w1"].astype(cd)
    w2 = params["w2"].astype(cd)
    b1 = params["b1"].astype(jnp.float32)
    b2 = params["b2"].astype(jnp.float32)
    gamma = params["gamma"].astype(jnp.float32)
    beta = params["beta"].astype(jnp.float32)

    row_in = pl.BlockSpec((row_tile, d_in), lambda i: (i, 0))
    row_out = pl.BlockSpec((row_tile, d_out), lambda i: (i, 0))
    full = lambda shape: pl.BlockSpec(shape, lambda i: (0, 0))   # resident in VMEM

    flops = 2 * M * (d_in * d_hidden + d_hidden * d_out)
    weight_bytes = w1.size * w1.dtype.itemsize + w2.size * w2.dtype.itemsize

    if use_res_linear:
        wr = params["wr"].astype(cd)
        br = params["br"].astype(jnp.float32)
        flops += 2 * M * d_in * d_out
        weight_bytes += wr.size * wr.dtype.itemsize
        if d_hidden % 128 == 0:
            # Pack [w1 | wr] so both x-matmuls become one lane-dense MXU launch;
            # slice at the 128-aligned lane boundary inside the kernel.
            wcat = jnp.concatenate([w1, wr], axis=1)      # (d_in, d_hidden + d_out)
            bcat = jnp.concatenate([b1, br], axis=1)      # (1, d_hidden + d_out)
            in_specs = [row_in,
                        full((d_in, d_hidden + d_out)), full((1, d_hidden + d_out)),
                        full((d_hidden, d_out)), full((1, d_out)),
                        full((1, d_out)), full((1, d_out))]
            args = [x2, wcat, bcat, w2, b2, gamma, beta]
            kernel = functools.partial(_ffm_res_fused_kernel, eps=eps,
                                       compute_dtype=cd, d_hidden=d_hidden)
        else:
            in_specs = [row_in,
                        full((d_in, d_hidden)), full((1, d_hidden)),
                        full((d_hidden, d_out)), full((1, d_out)),
                        full((d_in, d_out)), full((1, d_out)),
                        full((1, d_out)), full((1, d_out))]
            args = [x2, w1, b1, w2, b2, wr, br, gamma, beta]
            kernel = functools.partial(_ffm_res_kernel, eps=eps, compute_dtype=cd)
    else:
        in_specs = [row_in,
                    full((d_in, d_hidden)), full((1, d_hidden)),
                    full((d_hidden, d_out)), full((1, d_out)),
                    full((1, d_out)), full((1, d_out))]
        args = [x2, w1, b1, w2, b2, gamma, beta]
        kernel = functools.partial(_ffm_kernel, eps=eps, compute_dtype=cd)

    bytes_accessed = (x2.size * x2.dtype.itemsize
                      + M * d_out * jnp.dtype(x.dtype).itemsize
                      + weight_bytes)
    cost = pl.CostEstimate(flops=flops, transcendentals=M,
                           bytes_accessed=bytes_accessed)

    # TODO(synk): output lane width (d_out=32/64 < 128) forces masked partial
    # stores; fixing would require a lane-dense output layout change upstream.
    out = pl.pallas_call(
        kernel,
        out_shape=jax.ShapeDtypeStruct((M, d_out), x.dtype),
        grid_spec=pltpu.PrefetchScalarGridSpec(
            num_scalar_prefetch=0,
            grid=grid,
            in_specs=in_specs,
            out_specs=row_out,
        ),
        compiler_params=pltpu.CompilerParams(
            dimension_semantics=("parallel",),
            vmem_limit_bytes=32 * 1024 * 1024),
        cost_estimate=cost,
    )(*args)

    return out.reshape(*lead, d_out)


def ffm_reference(x, params, eps=1e-5):
    """Pure-JAX reference mirroring the PyTorch FFM.forward (eval / drop=0)."""
    h = jnp.maximum(jnp.einsum("...i,ij->...j", x, params["w1"])
                    + params["b1"][0], 0.0)
    y = jnp.einsum("...i,ij->...j", h, params["w2"]) + params["b2"][0]
    if "wr" in params:
        res = jnp.einsum("...i,ij->...j", x, params["wr"]) + params["br"][0]
    else:
        res = x
    z = res + y
    mean = jnp.mean(z, -1, keepdims=True)
    var = jnp.mean((z - mean) ** 2, -1, keepdims=True)
    zn = (z - mean) / jnp.sqrt(var + eps)
    return zn * params["gamma"][0] + params["beta"][0]


def _make_params(key, d_in, d_hidden, d_out, with_res):
    keys = jax.random.split(key, 8)
    s1 = (1.0 / d_in) ** 0.5
    s2 = (1.0 / d_hidden) ** 0.5
    p = {
        "w1": (s1 * jax.random.normal(keys[0], (d_in, d_hidden))).astype(jnp.float32),
        "b1": (s1 * jax.random.normal(keys[1], (1, d_hidden))).astype(jnp.float32),
        "w2": (s2 * jax.random.normal(keys[2], (d_hidden, d_out))).astype(jnp.float32),
        "b2": (s2 * jax.random.normal(keys[3], (1, d_out))).astype(jnp.float32),
        "gamma": (1.0 + 0.1 * jax.random.normal(keys[4], (1, d_out))).astype(jnp.float32),
        "beta": (0.01 * jax.random.normal(keys[5], (1, d_out))).astype(jnp.float32),
    }
    if with_res:
        p["wr"] = (s1 * jax.random.normal(keys[6], (d_in, d_out))).astype(jnp.float32)
        p["br"] = (s1 * jax.random.normal(keys[7], (1, d_out))).astype(jnp.float32)
    return p


if __name__ == "__main__":
    key = jax.random.PRNGKey(0)
    B, S, d_in, expansion = 2, 8, 32, 4           # batch, seq, channels
    d_hidden = d_in * expansion                   # 128 (lane-dense expansion)
    k_p1, k_p2, k_p3, k_x, k_xr = jax.random.split(key, 5)

    x = jax.random.normal(k_x, (B, S, d_in), dtype=jnp.float32)

    # 1) d_in == d_out -> residual is nn.Identity()
    params = _make_params(k_p1, d_in, d_hidden, d_in, with_res=False)
    out = ffm_forward(x, params)
    jax.block_until_ready(out)
    ref = ffm_reference(x, params)
    assert out.shape == (B, S, d_in)
    assert jnp.allclose(out, ref, atol=1e-4, rtol=1e-4), "FFM identity-res mismatch"

    # 2) d_in != d_out -> residual is nn.Linear(d_in, d_out); fused [w1|wr] path
    d_out2 = 64
    params2 = _make_params(k_p2, d_in, d_hidden, d_out2, with_res=True)
    out2 = ffm_forward(x, params2)
    jax.block_until_ready(out2)
    ref2 = ffm_reference(x, params2)
    assert out2.shape == (B, S, d_out2)
    assert jnp.allclose(out2, ref2, atol=1e-4, rtol=1e-4), "FFM fused linear-res mismatch"

    # 3) un-fused residual-linear fallback (d_hidden=96 not a multiple of 128)
    params3 = _make_params(k_p3, d_in, 96, 48, with_res=True)
    out3 = ffm_forward(x, params3)
    jax.block_until_ready(out3)
    ref3 = ffm_reference(x, params3)
    assert out3.shape == (B, S, 48)
    assert jnp.allclose(out3, ref3, atol=1e-4, rtol=1e-4), "FFM unfused linear-res mismatch"

    # 4) ragged M (no wrapper pad/slice): 2*7 = 14 rows, row_tile=8 -> tail block
    x_ragged = jax.random.normal(k_xr, (B, 7, d_in), dtype=jnp.float32)
    out4 = ffm_forward(x_ragged, params)
    jax.block_until_ready(out4)
    ref4 = ffm_reference(x_ragged, params)
    assert out4.shape == (B, 7, d_in)
    assert jnp.allclose(out4, ref4, atol=1e-4, rtol=1e-4), "FFM ragged-M mismatch"

    # 5) production bf16-operand path (f32 accumulation) compiles & runs
    out5 = ffm_forward(x, params2, compute_dtype=jnp.bfloat16)
    jax.block_until_ready(out5)
    assert out5.shape == (B, S, d_out2)
    assert bool(jnp.all(jnp.isfinite(out5))), "FFM bf16 path produced non-finite values"

    print("KERNEL_OK")
</pallas_src>

<mosaic_0001>
module attributes {stable_mosaic.version = 11 : i64} {
  func.func @_ffm_kernel(%arg0: i32, %arg1: memref<8x32xf32, #tpu.memory_space<vmem>>, %arg2: memref<32x128xf32, #tpu.memory_space<vmem>>, %arg3: memref<1x128xf32, #tpu.memory_space<vmem>>, %arg4: memref<128x32xf32, #tpu.memory_space<vmem>>, %arg5: memref<1x32xf32, #tpu.memory_space<vmem>>, %arg6: memref<1x32xf32, #tpu.memory_space<vmem>>, %arg7: memref<1x32xf32, #tpu.memory_space<vmem>>, %arg8: memref<8x32xf32, #tpu.memory_space<vmem>>) attributes {dimension_semantics = [#tpu.dimension_semantics<parallel>], iteration_bounds = array<i64: 2>, scalar_prefetch = 0 : i64, scratch_operands = 0 : i64, tpu.core_type = #tpu.core_type<tc>, window_params = [{transform_indices = @transform_0, window_bounds = array<i64: 8, 32>}, {pipeline_mode = #tpu.pipeline_mode<synchronous>, transform_indices = @transform_1, window_bounds = array<i64: 32, 128>}, {pipeline_mode = #tpu.pipeline_mode<synchronous>, transform_indices = @transform_2, window_bounds = array<i64: 1, 128>}, {pipeline_mode = #tpu.pipeline_mode<synchronous>, transform_indices = @transform_3, window_bounds = array<i64: 128, 32>}, {pipeline_mode = #tpu.pipeline_mode<synchronous>, transform_indices = @transform_4, window_bounds = array<i64: 1, 32>}, {pipeline_mode = #tpu.pipeline_mode<synchronous>, transform_indices = @transform_5, window_bounds = array<i64: 1, 32>}, {pipeline_mode = #tpu.pipeline_mode<synchronous>, transform_indices = @transform_6, window_bounds = array<i64: 1, 32>}, {transform_indices = @transform_7, window_bounds = array<i64: 8, 32>}]} {
    %c0 = arith.constant 0 : index
    %c0_0 = arith.constant 0 : index
    %0 = vector.load %arg1[%c0, %c0_0] : memref<8x32xf32, #tpu.memory_space<vmem>>, vector<8x32xf32>
    %c0_1 = arith.constant 0 : index
    %c0_2 = arith.constant 0 : index
    %1 = vector.load %arg2[%c0_1, %c0_2] : memref<32x128xf32, #tpu.memory_space<vmem>>, vector<32x128xf32>
    %cst = arith.constant dense<0.000000e+00> : vector<8x128xf32>
    %2 = tpu.matmul %0, %1, %cst {dimension_numbers = #tpu.dot_dimension_numbers<[1], [0], [0], [1], [0, 0, 1, 1], [], []>} : vector<8x32xf32>, vector<32x128xf32>, vector<8x128xf32> -> vector<8x128xf32>
    %c0_3 = arith.constant 0 : index
    %c0_4 = arith.constant 0 : index
    %3 = vector.load %arg3[%c0_3, %c0_4] : memref<1x128xf32, #tpu.memory_space<vmem>>, vector<1x128xf32>
    %4 = vector.broadcast %3 : vector<1x128xf32> to vector<8x128xf32>
    %5 = arith.addf %2, %4 : vector<8x128xf32>
    %cst_5 = arith.constant 0.000000e+00 : f32
    %6 = vector.broadcast %cst_5 : f32 to vector<8x128xf32>
    %7 = arith.maximumf %5, %6 : vector<8x128xf32>
    %c0_6 = arith.constant 0 : index
    %c0_7 = arith.constant 0 : index
    %8 = vector.load %arg4[%c0_6, %c0_7] : memref<128x32xf32, #tpu.memory_space<vmem>>, vector<128x32xf32>
    %cst_8 = arith.constant dense<0.000000e+00> : vector<8x32xf32>
    %9 = tpu.matmul %7, %8, %cst_8 {dimension_numbers = #tpu.dot_dimension_numbers<[1], [0], [0], [1], [0, 0, 1, 1], [], []>} : vector<8x128xf32>, vector<128x32xf32>, vector<8x32xf32> -> vector<8x32xf32>
    %c0_9 = arith.constant 0 : index
    %c0_10 = arith.constant 0 : index
    %10 = vector.load %arg5[%c0_9, %c0_10] : memref<1x32xf32, #tpu.memory_space<vmem>>, vector<1x32xf32>
    %11 = vector.broadcast %10 : vector<1x32xf32> to vector<8x32xf32>
    %12 = arith.addf %9, %11 : vector<8x32xf32>
    %13 = arith.addf %0, %12 : vector<8x32xf32>
    %c0_11 = arith.constant 0 : index
    %c0_12 = arith.constant 0 : index
    %14 = vector.load %arg6[%c0_11, %c0_12] : memref<1x32xf32, #tpu.memory_space<vmem>>, vector<1x32xf32>
    %c0_13 = arith.constant 0 : index
    %c0_14 = arith.constant 0 : index
    %15 = vector.load %arg7[%c0_13, %c0_14] : memref<1x32xf32, #tpu.memory_space<vmem>>, vector<1x32xf32>
    %cst_15 = arith.constant dense<0.000000e+00> : vector<8xf32>
    %16 = vector.multi_reduction <add>, %13, %cst_15 [1] : vector<8x32xf32> to vector<8xf32>
    %17 = vector.shape_cast %16 : vector<8xf32> to vector<8x1xf32>
    %cst_16 = arith.constant 3.200000e+01 : f32
    %18 = vector.broadcast %cst_16 : f32 to vector<8x1xf32>
    %19 = arith.divf %17, %18 : vector<8x1xf32>
    %20 = vector.broadcast %19 : vector<8x1xf32> to vector<8x32xf32>
    %21 = arith.subf %13, %20 : vector<8x32xf32>
    %22 = arith.mulf %21, %21 : vector<8x32xf32>
    %cst_17 = arith.constant dense<0.000000e+00> : vector<8xf32>
    %23 = vector.multi_reduction <add>, %22, %cst_17 [1] : vector<8x32xf32> to vector<8xf32>
    %24 = vector.shape_cast %23 : vector<8xf32> to vector<8x1xf32>
    %cst_18 = arith.constant 3.200000e+01 : f32
    %25 = vector.broadcast %cst_18 : f32 to vector<8x1xf32>
    %26 = arith.divf %24, %25 : vector<8x1xf32>
    %27 = vector.broadcast %19 : vector<8x1xf32> to vector<8x32xf32>
    %28 = arith.subf %13, %27 : vector<8x32xf32>
    %cst_19 = arith.constant 9.99999974E-6 : f32
    %29 = vector.broadcast %cst_19 : f32 to vector<8x1xf32>
    %30 = arith.addf %26, %29 : vector<8x1xf32>
    %31 = math.rsqrt %30 : vector<8x1xf32>
    %32 = vector.broadcast %31 : vector<8x1xf32> to vector<8x32xf32>
    %33 = arith.mulf %28, %32 : vector<8x32xf32>
    %34 = vector.broadcast %14 : vector<1x32xf32> to vector<8x32xf32>
    %35 = arith.mulf %33, %34 : vector<8x32xf32>
    %36 = vector.broadcast %15 : vector<1x32xf32> to vector<8x32xf32>
    %37 = arith.addf %35, %36 : vector<8x32xf32>
    %c0_20 = arith.constant 0 : index
    %c0_21 = arith.constant 0 : index
    %38 = vector.load %arg8[%c0_20, %c0_21] : memref<8x32xf32, #tpu.memory_space<vmem>>, vector<8x32xf32>
    tpu.vector_store %arg8[%c0_20, %c0_21], %37 {strides = array<i32>} : memref<8x32xf32, #tpu.memory_space<vmem>>, vector<8x32xf32>,
    return
  }
  func.func @transform_0(%arg0: i32) -> (i32, i32) {
    %c0_i32 = arith.constant 0 : i32
    %c0_i32_0 = arith.constant 0 : i32
    return %arg0, %c0_i32 : i32, i32
  }
  func.func @transform_1(%arg0: i32) -> (i32, i32) {
    %c0_i32 = arith.constant 0 : i32
    %c0_i32_0 = arith.constant 0 : i32
    %c0_i32_1 = arith.constant 0 : i32
    return %c0_i32, %c0_i32_0 : i32, i32
  }
  func.func @transform_2(%arg0: i32) -> (i32, i32) {
    %c0_i32 = arith.constant 0 : i32
    %c0_i32_0 = arith.constant 0 : i32
    %c0_i32_1 = arith.constant 0 : i32
    return %c0_i32, %c0_i32_0 : i32, i32
  }
  func.func @transform_3(%arg0: i32) -> (i32, i32) {
    %c0_i32 = arith.constant 0 : i32
    %c0_i32_0 = arith.constant 0 : i32
    %c0_i32_1 = arith.constant 0 : i32
    return %c0_i32, %c0_i32_0 : i32, i32
  }
  func.func @transform_4(%arg0: i32) -> (i32, i32) {
    %c0_i32 = arith.constant 0 : i32
    %c0_i32_0 = arith.constant 0 : i32
    %c0_i32_1 = arith.constant 0 : i32
    return %c0_i32, %c0_i32_0 : i32, i32
  }
  func.func @transform_5(%arg0: i32) -> (i32, i32) {
    %c0_i32 = arith.constant 0 : i32
    %c0_i32_0 = arith.constant 0 : i32
    %c0_i32_1 = arith.constant 0 : i32
    return %c0_i32, %c0_i32_0 : i32, i32
  }
  func.func @transform_6(%arg0: i32) -> (i32, i32) {
    %c0_i32 = arith.constant 0 : i32
    %c0_i32_0 = arith.constant 0 : i32
    %c0_i32_1 = arith.constant 0 : i32
    return %c0_i32, %c0_i32_0 : i32, i32
  }
  func.func @transform_7(%arg0: i32) -> (i32, i32) {
    %c0_i32 = arith.constant 0 : i32
    %c0_i32_0 = arith.constant 0 : i32
    return %arg0, %c0_i32 : i32, i32
  }
}

</mosaic_0001>

<bundles_post_ra>
// kernel: tpu_custom_call.1
= control target key start
LH: loop header
LB: loop body
LE: loop exit
PB: predicated region body
PF: predicated region fallthrough
CT: control target
= control target key end

     0   :  { %12 = vsyncpa [#allocation3], 0  ;;  %s789_s0 = inlined_call_operand.vmem [shape: f32[16,32], index: 0, kind: input, shape index: {}]   ;;  %s790_s1 = inlined_call_operand.vmem [shape: f32[32,128], index: 1, kind: input, shape index: {}]   ;;  %s791_s2 = inlined_call_operand.vmem [shape: f32[1,128], index: 2, kind: input, shape index: {}]   ;;  %s792_s3 = inlined_call_operand.vmem [shape: f32[128,32], index: 3, kind: input, shape index: {}]   ;;  %s793_s4 = inlined_call_operand.vmem [shape: f32[1,32], index: 4, kind: input, shape index: {}]   ;;  %s794_s5 = inlined_call_operand.vmem [shape: f32[1,32], index: 5, kind: input, shape index: {}]   ;;  %s795_s6 = inlined_call_operand.vmem [shape: f32[1,32], index: 6, kind: input, shape index: {}]   ;;  %s796_s7 = inlined_call_operand.hbm [shape: f32[16,32], index: 7, kind: output, shape index: {}]  }
   0x1   :  { %14 = vsyncpa [#allocation3 + $0x1], 0  ;;  %s628_s24 = smov 0   ;;  %s630_s25 = smov 0  }
   0x2   :  { %s632_s26 = smov 0   ;;  %s634_s27 = smov 0  }
   0x3 LB: > { %s649_s28 = sadd.s32 4294967295, %s585_s27   ;;  %s464_s29 = sadd.s32 4294967294, %s585_s27   ;;  %s585_s27 = sphi %s634_s27, %s802_s27   ;;  %s581_s26 = sphi %s632_s26, %s801_s26   ;;  %s577_s25 = sphi %s630_s25, %s800_s25   ;;  %s573_s24 = sphi %s628_s24, %s799_s24  }
   0x4   : > { %s653_s30 = sadd.s32 1, %s585_s27   ;;  %s179_s8 = sadd.s32 1, %s581_s26 }
   0x5   : > { %s176_s9 = ssub.s32 %s585_s27, %s653_s30  ;;  %p189_p0 = scmp.ne.s32.totalorder %s581_s26, %s577_s25 }
   0x6   : > { %p177_p1 = scmp.eq.s32.totalorder %s176_s9, 0  ;;  %p190_p2 = scmp.eq.s32.totalorder %s649_s28, 1 }
   0x7   : > { %p195_p3 = scmp.ne.s32.totalorder %s577_s25, %s573_s24  ;;  %p196_p4 = scmp.eq.s32.totalorder %s464_s29, 1 }
   0x8   : > { %s664_s10 = scalar_select %p177_p1, %s581_s26, %s179_s8  }
   0x9   : > { %p666_p5 = por %p190_p2, %p189_p0  ;;  %p670_p6 = por %p196_p4, %p195_p3 }
   0xa   : > { %p467_p7 = scmp.ge.s32.totalorder %s585_s27, 1  ;;  %p239_p8 = scmp.lt.s32.totalorder %s585_s27, 3 }
   0xc   : > { %p240_p9 = pnand %p467_p7, %p239_p8 }
   0xd   : > { %p270_p10 = scmp.lt.s32.totalorder (!%p240_p9), %s649_s28, 1  ;;  %s267_s20 = sand.u32 (!%p240_p9), 1, %s577_s25  }
   0xe   : > { %243 = sbr.rel (%p240_p9) target bundleno = 558 (0x22e), region = 48  ;;  %s468_s21 = sshll.u32 (!%p240_p9), %s267_s20, 3 }
   0xf   : > { %s472_s22 = sshll.u32 (!%p240_p9), %s649_s28, 3  ;;  %s269_s16 = scalar_lea.vmem (!%p240_p9), [#allocation2], %s468_s21 }
  0x10   : > { %s400_s13 = scalar_lea.hbm (!%p240_p9), %s796_s7, %s472_s22  ;;  %s390_s18 = scalar_lea.sflag (!%p240_p9), [#allocation3], %s267_s20 }
  0x11   : > { %s543_s21 = scalar_lea.hbm (!%p240_p9), %s796_s7, 16 }
  0x13   : > { %v278_v0 = vld [vmem:[%s790_s1 + $0x18] sm:$0xff]  ;;  %v277_v1 = vld [vmem:[%s790_s1 + $0x10] sm:$0xff]  ;;  %v276_v4 = vld [vmem:[%s790_s1 + $0x8] sm:$0xff]  ;;  %s271_s23 = scalar_select %p270_p10, %s649_s28, 1  ;;  %vm283_vm0 = vcmask 261120   ;;  %v587_v30 = vmov 32.0  }
  0x14   : > { %299 = vmatpush.msra.mxu0 %v278_v0  ;;  %v323_v2 = vld [vmem:[%s792_s3 + $0x78] sm:$0xff]  ;;  %v322_v3 = vld [vmem:[%s792_s3 + $0x70] sm:$0xff]  ;;  %v321_v5 = vld [vmem:[%s792_s3 + $0x68] sm:$0xff]  ;;  %519 = vrcp.f32 %v587_v30  ;;  %s402_s28 = sshll.u32 %s269_s16, 4  ;;  %s403_s28 = int_to_ptr.vmem [resolvable:$true] %s402_s28 }
  0x15   : > { %328 = vmatpush.msra.mxu1 %v323_v2  ;;  %v275_v6 = vld [vmem:[%s790_s1] sm:$0xff]  ;;  %s469_s14 = sshll.u32 %s271_s23, 3  ;;  %v319_v9 = vld [vmem:[%s792_s3 + $0x58] sm:$0xff]  ;;  %v318_v10 = vld [vmem:[%s792_s3 + $0x50] sm:$0xff] }
  0x16   : > { %300 = vmatpush.msra.mxu0 %v277_v1  ;;  %s273_s17 = scalar_lea.vmem %s789_s0, %s469_s14  ;;  %v320_v7 = vld [vmem:[%s792_s3 + $0x60] sm:$0xff]  ;;  %v317_v11 = vld [vmem:[%s792_s3 + $0x48] sm:$0xff]  ;;  %v315_v13 = vld [vmem:[%s792_s3 + $0x38] sm:$0xff] }
  0x17   : > { %329 = vmatpush.msra.mxu1 %v322_v3  ;;  %v274_v8 = vld [vmem:[%s273_s17] sm:$0xff]  ;;  %v314_v14 = vld [vmem:[%s792_s3 + $0x30] sm:$0xff]  ;;  %v313_v15 = vld [vmem:[%s792_s3 + $0x28] sm:$0xff]  ;;  %s404_s17 = sshll.u32 %s400_s13, 4  ;;  %s405_s17 = int_to_ptr.hbm [resolvable:$true] %s404_s17 }
  0x18   : > { %301 = vmatpush.msra.mxu0 %v276_v4  ;;  %v316_v12 = vld [vmem:[%s792_s3 + $0x40] sm:$0xff]  ;;  %v311_v17 = vld [vmem:[%s792_s3 + $0x18] sm:$0xff]  ;;  %v310_v18 = vld [vmem:[%s792_s3 + $0x10] sm:$0xff]  ;;  %s537_s19 = sshra.s32 %s405_s17, 4  ;;  %s538_s19 = int_to_ptr.hbm [resolvable:$true] %s537_s19 }
  0x19   : > { %330 = vmatpush.msra.mxu1 %v321_v5  ;;  %v312_v16 = vld [vmem:[%s792_s3 + $0x20] sm:$0xff]  ;;  %v309_v19 = vld [vmem:[%s792_s3 + $0x8] sm:$0xff]  ;;  %s539_s22 = scalar_lea.hbm %s538_s19, 8  ;;  %p544_p0 = scmp.lt.s32.totalorder %s538_s19, %s796_s7 }
  0x1a   : > { %302 = vmatpush.msra.mxu0 %v275_v6  ;;  %v308_v20 = vld [vmem:[%s792_s3] sm:$0xff]  ;;  %v520_v31 = vpop.eup %519  ;;  %p540_p11 = scmp.ne.s32.totalorder %s538_s19, %s539_s22  ;;  %p545_p1 = scmp.lt.s32.totalorder %s543_s21, %s539_s22 }
  0x1b   : > { %470 = vmatmul.msk.f32.vlgmr.msra.gmra.mxu0 %vm283_vm0, %v274_v8  ;;  %331 = vmatpush.msra.mxu1 %v320_v7  ;;  %v515_v21 = vld [vmem:[%s791_s2] ss:$0 sm:$0xff]  ;;  %v355_v32 = vmul.f32 32.0, %v520_v31  ;;  %vm359_vm1 = vweird.f32 %v520_v31 }
  0x1c   : > { %v516_v25 = vld [vmem:[%s793_s4] ss:$0 sm:$0xff]  ;;  %p541_p12 = pnand %p540_p11, %p666_p5  ;;  %p546_p2 = por %p545_p1, %p544_p0 }
  0x1d   : > { %332 = vmatpush.msra.mxu1 %v319_v9  ;;  %v356_v33 = vsub.f32 1.0, %v355_v32  ;;  %v517_v51 = vld [vmem:[%s794_s5] ss:$0 sm:$0xff] }
  0x1e   : > { %v518_v54 = vld [vmem:[%s795_s6] ss:$0 sm:$0xff]  ;;  %p542_p13 = pneg %p541_p12 }
  0x1f   : > { %333 = vmatpush.msra.mxu1 %v318_v10  ;;  %v357_v34 = vmul.f32 %v520_v31, %v356_v33 }
  0x20   : > { %p547_p3 = pnand %p546_p2, %p542_p13 }
  0x21   : > { %334 = vmatpush.msra.mxu1 %v317_v11  ;;  %v358_v35 = vadd.f32 %v520_v31, %v357_v34 }
  0x23   : > { %335 = vmatpush.msra.mxu1 %v316_v12  ;;  %v360_v36 = vsel %vm359_vm1, %v520_v31, %v358_v35 }
  0x25   : > { %336 = vmatpush.msra.mxu1 %v315_v13 }
  0x27   : > { %337 = vmatpush.msra.mxu1 %v314_v14 }
  0x29   : > { %338 = vmatpush.msra.mxu1 %v313_v15 }
  0x2b   : > { %339 = vmatpush.msra.mxu1 %v312_v16 }
  0x2d   : > { %340 = vmatpush.msra.mxu1 %v311_v17 }
  0x2f   : > { %341 = vmatpush.msra.mxu1 %v310_v18 }
  0x31   : > { %342 = vmatpush.msra.mxu1 %v309_v19 }
  0x33   : > { %343 = vmatpush.msra.mxu1 %v308_v20 }
  0x98   : > { %v304_v22 = vpop.f32.mrf.mxu0 }
  0x99   : > { %v305_v23 = vadd.f32 %v515_v21, %v304_v22 }
  0x9b   : > { %v307_v24 = vmax.f32 %v305_v23, 0.0 }
  0x9d   : > { %344 = vmatmul.f32.vlgmr.msra.gmra.mxu1 %v307_v24 }
 0x11a   : > { %v345_v26 = vpop.f32.mrf.mxu1 }
 0x11b   : > { %v346_v27 = vadd.f32 %v516_v25, %v345_v26 }
 0x11d   : > { %v348_v28 = vadd.f32 %v346_v27, %v274_v8 }
 0x11f   : > { %v351_v29 = vsel %vm283_vm0, %v348_v28, 0.0 }
 0x120   : > { %352 = vadd.xlane.f32.xlu0 %v351_v29 }
 0x193   : > { %v353_v37 = vpop.xlane.xlu0 %352 }
 0x194   : > { %v361_v38 = vmul.f32 %v360_v36, %v353_v37 }
 0x196   : > { %v362_v39 = vsub.f32 %v348_v28, %v361_v38 }
 0x198   : > { %v363_v40 = vmul.f32 %v362_v39, %v362_v39 }
 0x19a   : > { %v364_v41 = vsel %vm283_vm0, %v363_v40, 0.0 }
 0x19b   : > { %365 = vadd.xlane.f32.xlu0 %v364_v41 }
 0x20e   : > { %v366_v42 = vpop.xlane.xlu0 %365 }
 0x20f   : > { %v367_v43 = vmul.f32 %v366_v42, %v360_v36 }
 0x211   : > { %v368_v44 = vadd.f32 1e-05, %v367_v43 }
 0x213   : > { %521 = vrsqrt.f32 %v368_v44  ;;  %vm375_vm3 = vweird.f32 %v368_v44 }
 0x219   : > { %v522_v45 = vpop.eup %521 }
 0x21a   : > { %v370_v46 = vmul.f32 %v522_v45, %v368_v44  ;;  %vm376_vm2 = vweird.f32 %v522_v45 }
 0x21b   : > { %vm377_vm4 = vmor %vm375_vm3, %vm376_vm2 }
 0x21c   : > { %v371_v47 = vmul.f32 %v522_v45, %v370_v46 }
 0x21e   : > { %v372_v48 = vmul.f32 0.5, %v371_v47 }
 0x220   : > { %v373_v49 = vsub.f32 1.5, %v372_v48 }
 0x222   : > { %v374_v50 = vmul.f32 %v522_v45, %v373_v49 }
 0x224   : > { %v378_v52 = vsel %vm377_vm4, %v522_v45, %v374_v50 }
 0x225   : > { %v379_v53 = vmul.f32 %v378_v52, %v362_v39 }
 0x227   : > { %v383_v55 = vmul.f32 %v517_v51, %v379_v53 }
 0x229   : > { %v387_v56 = vadd.f32 %v518_v54, %v383_v55 }
 0x22b   : > { %388 = vst.msk [vmem:[%s269_s16] sm:$0xff] %vm283_vm0, %v387_v56 }
 0x22c   : > { %550 = shalt.err (!%p547_p3)
}
 0x22d   : > { %475 = dma.vmem_to_hbm [thread:$0]  (%p666_p5), %s403_s28, 128, %s405_s17, %s390_s18  }
 0x22e PF: > { %p481_p4 = scmp.ge.s32.totalorder %s585_s27, 2  ;;  %s416_s20 = sand.u32 1, %s573_s24  }
 0x22f   : > { %s417_s13 = scalar_lea.sflag [#allocation3], %s416_s20 }
 0x230   : > { %p478_p7 = pnand %p481_p4, %p670_p6 }
 0x232   : > { %p479_p8 = pneg %p478_p7 }
 0x234   : > { %568 = dma.done.wait (%p479_p8), %s417_s13, 128  }
 0x235   : > { %570 = vsyncadd (%p479_p8), %s417_s13, 4294967168  ;;  %p17_p9 = scmp.ge.s32.totalorder %s653_s30, 4   ;;  %s799_s24 = smov %s577_s25 }
 0x236   : > { %s800_s25 = smov %s581_s26  ;;  %s801_s26 = smov %s664_s10 }
 0x237   : > { %s802_s27 = smov %s653_s30  ;;  %19 = sbr.rel (!%p17_p9) target bundleno = 3 (0x3), region = 83 }
 0x23c   :  { %423 = vsyncpa [#allocation3], 1 }
 0x23d   :  { %425 = vsyncpa [#allocation3 + $0x1], 1 }

</bundles_post_ra>
